<compile_context>
chip_gen: v7x
topology: tpu7x:2x2x1
jax: 0.10.0
libtpu: 0.0.40
codegen_flags: <defaults>
</compile_context>

<pallas_src>
import jax
import jax.numpy as jnp
from jax import lax
from jax.experimental import pallas as pl
from jax.experimental.pallas import tpu as pltpu
import numpy as np

INPUT_SIZE = 1
HIDDEN = 10
OUTPUT = 1
SEQ = 8
BATCH = 7          # fixed by forward(): input_seq.view(len(input_seq), 7, -1)
LANE = 128         # TPU vreg lane width; one gate per lane tile
GATE_COLS = 4 * LANE


def lstm_dense_kernel(x_ref, w_ref, out_ref):
    """Whole-sequence LSTM + final dense; single grid point, everything resident in VMEM.

    x_ref : (seq, batch, 1)  time-major input
    w_ref : (H+3, 4*128) packed params; gates live in separate 128-lane tiles
            (tile 0 = i, tile 1 = f, tile 2 = g, tile 3 = o; only lanes 0..H-1 of each
             tile are nonzero):
              rows 0..H-1 : W_hh^T  (gate columns scattered to their lane tiles)
              row  H      : W_ih^T  (input_size == 1 -> one row)
              row  H+1    : b_ih + b_hh
              row  H+2    : lanes 0..H-1 = W_dense row, lane H = b_dense
    out_ref : (batch, O)
    """
    H = HIDDEN

    # Loop-invariant weights, sliced directly off the ref (tile-aligned loads, done once).
    whh = w_ref[0:H, :]                         # (H, 4*128)  recurrent weights
    wih_row = w_ref[H:H + 1, :]                 # (1, 4*128)
    bias = w_ref[H + 1:H + 2, :]                # (1, 4*128)
    wd_row = w_ref[H + 2:H + 3, 0:H]            # (1, H)   dense weights (lane-aligned to h)
    bd = w_ref[H + 2:H + 3, H:H + 1]            # (1, 1)   dense bias

    h = jnp.zeros((BATCH, H), jnp.float32)
    c = jnp.zeros((BATCH, H), jnp.float32)

    # Fully-unrolled recurrence; h/c live in vregs, all slices static and lane-tile aligned.
    for t in range(SEQ):
        # Input projection recomputed per step (independent of h -> off the critical chain).
        xg = x_ref[t] * wih_row + bias                                   # (batch, 4*128)
        gates = xg + jnp.dot(h, whh, preferred_element_type=jnp.float32)  # (batch, 4*128)

        # Each gate starts at offset 0 of its own lane tile -> no lane relayout vs h/c.
        i_g = jax.nn.sigmoid(gates[:, 0 * LANE:0 * LANE + H])
        f_g = jax.nn.sigmoid(gates[:, 1 * LANE:1 * LANE + H])
        g_g = jnp.tanh(gates[:, 2 * LANE:2 * LANE + H])
        o_g = jax.nn.sigmoid(gates[:, 3 * LANE:3 * LANE + H])

        c = f_g * c + i_g * g_g
        h = o_g * jnp.tanh(c)

    # predictions[-1] == dense(h at the last timestep): VPU multiply + cross-lane reduce
    # (avoids an MXU push/drain for a single output column at the kernel tail).
    out_ref[...] = jnp.sum(h * wd_row, axis=-1, keepdims=True) + bd


def prepare_params(params):
    """One-time packing: transpose weights, sum biases, scatter each gate's H columns to
    its own 128-lane tile, and append the dense row/bias.  Shape: (H+3, 4*128)."""
    H = HIDDEN
    wih_t = np.asarray(params["w_ih"], np.float32).T        # (1, 4H)
    whh_t = np.asarray(params["w_hh"], np.float32).T        # (H, 4H)
    b = (np.asarray(params["b_ih"], np.float32)
         + np.asarray(params["b_hh"], np.float32))          # (4H,)
    wd = np.asarray(params["w_dense"], np.float32)          # (O, H)
    bd = np.asarray(params["b_dense"], np.float32)          # (O,)

    W = np.zeros((H + 3, GATE_COLS), np.float32)
    # PyTorch gate order along the 4H axis is (i, f, g, o); keep that order, one tile each.
    for tile in range(4):
        src = slice(tile * H, (tile + 1) * H)
        dst = slice(tile * LANE, tile * LANE + H)
        W[0:H, dst] = whh_t[:, src]
        W[H, dst] = wih_t[0, src]
        W[H + 1, dst] = b[src]
    W[H + 2, 0:H] = wd[0, :]
    W[H + 2, H] = bd[0]
    return jnp.asarray(W)


@jax.jit
def recurrent_nn_forward(input_seq, w_packed):
    """input_seq: (seq, 7) float array (input_size=1). Returns (7, 1)."""
    x = input_seq.reshape(input_seq.shape[0], BATCH, INPUT_SIZE).astype(jnp.float32)
    return pl.pallas_call(
        lstm_dense_kernel,
        out_shape=jax.ShapeDtypeStruct((BATCH, OUTPUT), jnp.float32),
        in_specs=[pl.BlockSpec(memory_space=pltpu.MemorySpace.VMEM),
                  pl.BlockSpec(memory_space=pltpu.MemorySpace.VMEM)],
        out_specs=pl.BlockSpec(memory_space=pltpu.MemorySpace.VMEM),
    )(x, w_packed)


def reference_forward(input_seq, params):
    """Pure-JAX reference (matches PyTorch nn.LSTM + nn.Linear semantics)."""
    x = input_seq.reshape(input_seq.shape[0], BATCH, -1).astype(jnp.float32)
    H = HIDDEN
    wih_t = params["w_ih"].T
    whh_t = params["w_hh"].T
    b = params["b_ih"] + params["b_hh"]

    def step(carry, x_t):
        h, c = carry
        gates = x_t @ wih_t + h @ whh_t + b
        i = jax.nn.sigmoid(gates[:, 0:H])
        f = jax.nn.sigmoid(gates[:, H:2 * H])
        g = jnp.tanh(gates[:, 2 * H:3 * H])
        o = jax.nn.sigmoid(gates[:, 3 * H:4 * H])
        c_new = f * c + i * g
        h_new = o * jnp.tanh(c_new)
        return (h_new, c_new), h_new

    h0 = jnp.zeros((BATCH, H), jnp.float32)
    c0 = jnp.zeros((BATCH, H), jnp.float32)
    (h_last, _), _ = lax.scan(step, (h0, c0), x)
    return h_last @ params["w_dense"].T + params["b_dense"]


def init_params(key):
    """Deterministic init with PyTorch-style uniform(-1/sqrt(H), 1/sqrt(H)) scales."""
    k = 1.0 / np.sqrt(HIDDEN)
    keys = jax.random.split(key, 6)
    return {
        "w_ih": jax.random.uniform(keys[0], (4 * HIDDEN, INPUT_SIZE), jnp.float32, -k, k),
        "w_hh": jax.random.uniform(keys[1], (4 * HIDDEN, HIDDEN), jnp.float32, -k, k),
        "b_ih": jax.random.uniform(keys[2], (4 * HIDDEN,), jnp.float32, -k, k),
        "b_hh": jax.random.uniform(keys[3], (4 * HIDDEN,), jnp.float32, -k, k),
        "w_dense": jax.random.uniform(keys[4], (OUTPUT, HIDDEN), jnp.float32, -k, k),
        "b_dense": jax.random.uniform(keys[5], (OUTPUT,), jnp.float32, -k, k),
    }


if __name__ == "__main__":
    root = jax.random.PRNGKey(0)
    pkey, xkey = jax.random.split(root)
    params = init_params(pkey)
    w_packed = jax.block_until_ready(prepare_params(params))   # one-time packing

    # input_seq: (seq=8, 7) so that .view(len, 7, -1) -> (8, 7, 1), input_size=1
    input_seq = jax.random.normal(xkey, (SEQ, BATCH), jnp.float32)

    out = jax.block_until_ready(recurrent_nn_forward(input_seq, w_packed))
    ref = jax.block_until_ready(reference_forward(input_seq, params))

    assert out.shape == (BATCH, OUTPUT), out.shape
    np.testing.assert_allclose(np.asarray(out), np.asarray(ref), rtol=1e-4, atol=1e-5)
    print("KERNEL_OK")
</pallas_src>

<mosaic_0001>
module attributes {stable_mosaic.version = 11 : i64} {
  func.func @lstm_dense_kernel(%arg0: memref<8x7x1xf32, #tpu.memory_space<vmem>>, %arg1: memref<13x512xf32, #tpu.memory_space<vmem>>, %arg2: memref<7x1xf32, #tpu.memory_space<vmem>>) attributes {dimension_semantics = [], scalar_prefetch = 0 : i64, scratch_operands = 0 : i64, tpu.core_type = #tpu.core_type<tc>} {
    %c0 = arith.constant 0 : index
    %c0_0 = arith.constant 0 : index
    %0 = vector.load %arg1[%c0, %c0_0] : memref<13x512xf32, #tpu.memory_space<vmem>>, vector<10x512xf32>
    %c10 = arith.constant 10 : index
    %c0_1 = arith.constant 0 : index
    %1 = vector.load %arg1[%c10, %c0_1] : memref<13x512xf32, #tpu.memory_space<vmem>>, vector<1x512xf32>
    %c11 = arith.constant 11 : index
    %c0_2 = arith.constant 0 : index
    %2 = vector.load %arg1[%c11, %c0_2] : memref<13x512xf32, #tpu.memory_space<vmem>>, vector<1x512xf32>
    %c12 = arith.constant 12 : index
    %c0_3 = arith.constant 0 : index
    %3 = vector.load %arg1[%c12, %c0_3] : memref<13x512xf32, #tpu.memory_space<vmem>>, vector<1x10xf32>
    %c12_4 = arith.constant 12 : index
    %c10_5 = arith.constant 10 : index
    %4 = vector.load %arg1[%c12_4, %c10_5] : memref<13x512xf32, #tpu.memory_space<vmem>>, vector<1x1xf32>
    %cst = arith.constant 0.000000e+00 : f32
    %5 = vector.broadcast %cst : f32 to vector<7x10xf32>
    %cst_6 = arith.constant 0.000000e+00 : f32
    %6 = vector.broadcast %cst_6 : f32 to vector<7x10xf32>
    %c0_7 = arith.constant 0 : index
    %c0_8 = arith.constant 0 : index
    %c0_9 = arith.constant 0 : index
    %7 = vector.load %arg0[%c0_7, %c0_8, %c0_9] : memref<8x7x1xf32, #tpu.memory_space<vmem>>, vector<1x7x1xf32>
    %8 = vector.shape_cast %7 : vector<1x7x1xf32> to vector<7x1xf32>
    %9 = vector.broadcast %8 : vector<7x1xf32> to vector<7x512xf32>
    %10 = vector.broadcast %1 : vector<1x512xf32> to vector<7x512xf32>
    %11 = arith.mulf %9, %10 : vector<7x512xf32>
    %12 = vector.broadcast %2 : vector<1x512xf32> to vector<7x512xf32>
    %13 = arith.addf %11, %12 : vector<7x512xf32>
    %cst_10 = arith.constant dense<0.000000e+00> : vector<7x512xf32>
    %14 = tpu.matmul %5, %0, %cst_10 {dimension_numbers = #tpu.dot_dimension_numbers<[1], [0], [0], [1], [0, 0, 1, 1], [], []>} : vector<7x10xf32>, vector<10x512xf32>, vector<7x512xf32> -> vector<7x512xf32>
    %15 = arith.addf %13, %14 : vector<7x512xf32>
    %16 = vector.extract_strided_slice %15 {offsets = [0, 0], sizes = [7, 10], strides = [1, 1]} : vector<7x512xf32> to vector<7x10xf32>
    %17 = arith.negf %16 : vector<7x10xf32>
    %18 = math.exp %17 : vector<7x10xf32>
    %cst_11 = arith.constant 1.000000e+00 : f32
    %19 = vector.broadcast %cst_11 : f32 to vector<7x10xf32>
    %20 = arith.addf %19, %18 : vector<7x10xf32>
    %21 = arith.divf %19, %20 : vector<7x10xf32>
    %22 = vector.extract_strided_slice %15 {offsets = [0, 128], sizes = [7, 10], strides = [1, 1]} : vector<7x512xf32> to vector<7x10xf32>
    %23 = arith.negf %22 : vector<7x10xf32>
    %24 = math.exp %23 : vector<7x10xf32>
    %cst_12 = arith.constant 1.000000e+00 : f32
    %25 = vector.broadcast %cst_12 : f32 to vector<7x10xf32>
    %26 = arith.addf %25, %24 : vector<7x10xf32>
    %27 = arith.divf %25, %26 : vector<7x10xf32>
    %28 = vector.extract_strided_slice %15 {offsets = [0, 256], sizes = [7, 10], strides = [1, 1]} : vector<7x512xf32> to vector<7x10xf32>
    %29 = math.tanh %28 : vector<7x10xf32>
    %30 = vector.extract_strided_slice %15 {offsets = [0, 384], sizes = [7, 10], strides = [1, 1]} : vector<7x512xf32> to vector<7x10xf32>
    %31 = arith.negf %30 : vector<7x10xf32>
    %32 = math.exp %31 : vector<7x10xf32>
    %cst_13 = arith.constant 1.000000e+00 : f32
    %33 = vector.broadcast %cst_13 : f32 to vector<7x10xf32>
    %34 = arith.addf %33, %32 : vector<7x10xf32>
    %35 = arith.divf %33, %34 : vector<7x10xf32>
    %36 = arith.mulf %27, %6 : vector<7x10xf32>
    %37 = arith.mulf %21, %29 : vector<7x10xf32>
    %38 = arith.addf %36, %37 : vector<7x10xf32>
    %39 = math.tanh %38 : vector<7x10xf32>
    %40 = arith.mulf %35, %39 : vector<7x10xf32>
    %c1 = arith.constant 1 : index
    %c0_14 = arith.constant 0 : index
    %c0_15 = arith.constant 0 : index
    %41 = vector.load %arg0[%c1, %c0_14, %c0_15] : memref<8x7x1xf32, #tpu.memory_space<vmem>>, vector<1x7x1xf32>
    %42 = vector.shape_cast %41 : vector<1x7x1xf32> to vector<7x1xf32>
    %43 = vector.broadcast %42 : vector<7x1xf32> to vector<7x512xf32>
    %44 = vector.broadcast %1 : vector<1x512xf32> to vector<7x512xf32>
    %45 = arith.mulf %43, %44 : vector<7x512xf32>
    %46 = vector.broadcast %2 : vector<1x512xf32> to vector<7x512xf32>
    %47 = arith.addf %45, %46 : vector<7x512xf32>
    %cst_16 = arith.constant dense<0.000000e+00> : vector<7x512xf32>
    %48 = tpu.matmul %40, %0, %cst_16 {dimension_numbers = #tpu.dot_dimension_numbers<[1], [0], [0], [1], [0, 0, 1, 1], [], []>} : vector<7x10xf32>, vector<10x512xf32>, vector<7x512xf32> -> vector<7x512xf32>
    %49 = arith.addf %47, %48 : vector<7x512xf32>
    %50 = vector.extract_strided_slice %49 {offsets = [0, 0], sizes = [7, 10], strides = [1, 1]} : vector<7x512xf32> to vector<7x10xf32>
    %51 = arith.negf %50 : vector<7x10xf32>
    %52 = math.exp %51 : vector<7x10xf32>
    %cst_17 = arith.constant 1.000000e+00 : f32
    %53 = vector.broadcast %cst_17 : f32 to vector<7x10xf32>
    %54 = arith.addf %53, %52 : vector<7x10xf32>
    %55 = arith.divf %53, %54 : vector<7x10xf32>
    %56 = vector.extract_strided_slice %49 {offsets = [0, 128], sizes = [7, 10], strides = [1, 1]} : vector<7x512xf32> to vector<7x10xf32>
    %57 = arith.negf %56 : vector<7x10xf32>
    %58 = math.exp %57 : vector<7x10xf32>
    %cst_18 = arith.constant 1.000000e+00 : f32
    %59 = vector.broadcast %cst_18 : f32 to vector<7x10xf32>
    %60 = arith.addf %59, %58 : vector<7x10xf32>
    %61 = arith.divf %59, %60 : vector<7x10xf32>
    %62 = vector.extract_strided_slice %49 {offsets = [0, 256], sizes = [7, 10], strides = [1, 1]} : vector<7x512xf32> to vector<7x10xf32>
    %63 = math.tanh %62 : vector<7x10xf32>
    %64 = vector.extract_strided_slice %49 {offsets = [0, 384], sizes = [7, 10], strides = [1, 1]} : vector<7x512xf32> to vector<7x10xf32>
    %65 = arith.negf %64 : vector<7x10xf32>
    %66 = math.exp %65 : vector<7x10xf32>
    %cst_19 = arith.constant 1.000000e+00 : f32
    %67 = vector.broadcast %cst_19 : f32 to vector<7x10xf32>
    %68 = arith.addf %67, %66 : vector<7x10xf32>
    %69 = arith.divf %67, %68 : vector<7x10xf32>
    %70 = arith.mulf %61, %38 : vector<7x10xf32>
    %71 = arith.mulf %55, %63 : vector<7x10xf32>
    %72 = arith.addf %70, %71 : vector<7x10xf32>
    %73 = math.tanh %72 : vector<7x10xf32>
    %74 = arith.mulf %69, %73 : vector<7x10xf32>
    %c2 = arith.constant 2 : index
    %c0_20 = arith.constant 0 : index
    %c0_21 = arith.constant 0 : index
    %75 = vector.load %arg0[%c2, %c0_20, %c0_21] : memref<8x7x1xf32, #tpu.memory_space<vmem>>, vector<1x7x1xf32>
    %76 = vector.shape_cast %75 : vector<1x7x1xf32> to vector<7x1xf32>
    %77 = vector.broadcast %76 : vector<7x1xf32> to vector<7x512xf32>
    %78 = vector.broadcast %1 : vector<1x512xf32> to vector<7x512xf32>
    %79 = arith.mulf %77, %78 : vector<7x512xf32>
    %80 = vector.broadcast %2 : vector<1x512xf32> to vector<7x512xf32>
    %81 = arith.addf %79, %80 : vector<7x512xf32>
    %cst_22 = arith.constant dense<0.000000e+00> : vector<7x512xf32>
    %82 = tpu.matmul %74, %0, %cst_22 {dimension_numbers = #tpu.dot_dimension_numbers<[1], [0], [0], [1], [0, 0, 1, 1], [], []>} : vector<7x10xf32>, vector<10x512xf32>, vector<7x512xf32> -> vector<7x512xf32>
    %83 = arith.addf %81, %82 : vector<7x512xf32>
    %84 = vector.extract_strided_slice %83 {offsets = [0, 0], sizes = [7, 10], strides = [1, 1]} : vector<7x512xf32> to vector<7x10xf32>
    %85 = arith.negf %84 : vector<7x10xf32>
    %86 = math.exp %85 : vector<7x10xf32>
    %cst_23 = arith.constant 1.000000e+00 : f32
    %87 = vector.broadcast %cst_23 : f32 to vector<7x10xf32>
    %88 = arith.addf %87, %86 : vector<7x10xf32>
    %89 = arith.divf %87, %88 : vector<7x10xf32>
    %90 = vector.extract_strided_slice %83 {offsets = [0, 128], sizes = [7, 10], strides = [1, 1]} : vector<7x512xf32> to vector<7x10xf32>
    %91 = arith.negf %90 : vector<7x10xf32>
    %92 = math.exp %91 : vector<7x10xf32>
    %cst_24 = arith.constant 1.000000e+00 : f32
    %93 = vector.broadcast %cst_24 : f32 to vector<7x10xf32>
    %94 = arith.addf %93, %92 : vector<7x10xf32>
    %95 = arith.divf %93, %94 : vector<7x10xf32>
    %96 = vector.extract_strided_slice %83 {offsets = [0, 256], sizes = [7, 10], strides = [1, 1]} : vector<7x512xf32> to vector<7x10xf32>
    %97 = math.tanh %96 : vector<7x10xf32>
    %98 = vector.extract_strided_slice %83 {offsets = [0, 384], sizes = [7, 10], strides = [1, 1]} : vector<7x512xf32> to vector<7x10xf32>
    %99 = arith.negf %98 : vector<7x10xf32>
    %100 = math.exp %99 : vector<7x10xf32>
    %cst_25 = arith.constant 1.000000e+00 : f32
    %101 = vector.broadcast %cst_25 : f32 to vector<7x10xf32>
    %102 = arith.addf %101, %100 : vector<7x10xf32>
    %103 = arith.divf %101, %102 : vector<7x10xf32>
    %104 = arith.mulf %95, %72 : vector<7x10xf32>
    %105 = arith.mulf %89, %97 : vector<7x10xf32>
    %106 = arith.addf %104, %105 : vector<7x10xf32>
    %107 = math.tanh %106 : vector<7x10xf32>
    %108 = arith.mulf %103, %107 : vector<7x10xf32>
    %c3 = arith.constant 3 : index
    %c0_26 = arith.constant 0 : index
    %c0_27 = arith.constant 0 : index
    %109 = vector.load %arg0[%c3, %c0_26, %c0_27] : memref<8x7x1xf32, #tpu.memory_space<vmem>>, vector<1x7x1xf32>
    %110 = vector.shape_cast %109 : vector<1x7x1xf32> to vector<7x1xf32>
    %111 = vector.broadcast %110 : vector<7x1xf32> to vector<7x512xf32>
    %112 = vector.broadcast %1 : vector<1x512xf32> to vector<7x512xf32>
    %113 = arith.mulf %111, %112 : vector<7x512xf32>
    %114 = vector.broadcast %2 : vector<1x512xf32> to vector<7x512xf32>
    %115 = arith.addf %113, %114 : vector<7x512xf32>
    %cst_28 = arith.constant dense<0.000000e+00> : vector<7x512xf32>
    %116 = tpu.matmul %108, %0, %cst_28 {dimension_numbers = #tpu.dot_dimension_numbers<[1], [0], [0], [1], [0, 0, 1, 1], [], []>} : vector<7x10xf32>, vector<10x512xf32>, vector<7x512xf32> -> vector<7x512xf32>
    %117 = arith.addf %115, %116 : vector<7x512xf32>
    %118 = vector.extract_strided_slice %117 {offsets = [0, 0], sizes = [7, 10], strides = [1, 1]} : vector<7x512xf32> to vector<7x10xf32>
    %119 = arith.negf %118 : vector<7x10xf32>
    %120 = math.exp %119 : vector<7x10xf32>
    %cst_29 = arith.constant 1.000000e+00 : f32
    %121 = vector.broadcast %cst_29 : f32 to vector<7x10xf32>
    %122 = arith.addf %121, %120 : vector<7x10xf32>
    %123 = arith.divf %121, %122 : vector<7x10xf32>
    %124 = vector.extract_strided_slice %117 {offsets = [0, 128], sizes = [7, 10], strides = [1, 1]} : vector<7x512xf32> to vector<7x10xf32>
    %125 = arith.negf %124 : vector<7x10xf32>
    %126 = math.exp %125 : vector<7x10xf32>
    %cst_30 = arith.constant 1.000000e+00 : f32
    %127 = vector.broadcast %cst_30 : f32 to vector<7x10xf32>
    %128 = arith.addf %127, %126 : vector<7x10xf32>
    %129 = arith.divf %127, %128 : vector<7x10xf32>
    %130 = vector.extract_strided_slice %117 {offsets = [0, 256], sizes = [7, 10], strides = [1, 1]} : vector<7x512xf32> to vector<7x10xf32>
    %131 = math.tanh %130 : vector<7x10xf32>
    %132 = vector.extract_strided_slice %117 {offsets = [0, 384], sizes = [7, 10], strides = [1, 1]} : vector<7x512xf32> to vector<7x10xf32>
    %133 = arith.negf %132 : vector<7x10xf32>
    %134 = math.exp %133 : vector<7x10xf32>
    %cst_31 = arith.constant 1.000000e+00 : f32
    %135 = vector.broadcast %cst_31 : f32 to vector<7x10xf32>
    %136 = arith.addf %135, %134 : vector<7x10xf32>
    %137 = arith.divf %135, %136 : vector<7x10xf32>
    %138 = arith.mulf %129, %106 : vector<7x10xf32>
    %139 = arith.mulf %123, %131 : vector<7x10xf32>
    %140 = arith.addf %138, %139 : vector<7x10xf32>
    %141 = math.tanh %140 : vector<7x10xf32>
    %142 = arith.mulf %137, %141 : vector<7x10xf32>
    %c4 = arith.constant 4 : index
    %c0_32 = arith.constant 0 : index
    %c0_33 = arith.constant 0 : index
    %143 = vector.load %arg0[%c4, %c0_32, %c0_33] : memref<8x7x1xf32, #tpu.memory_space<vmem>>, vector<1x7x1xf32>
    %144 = vector.shape_cast %143 : vector<1x7x1xf32> to vector<7x1xf32>
    %145 = vector.broadcast %144 : vector<7x1xf32> to vector<7x512xf32>
    %146 = vector.broadcast %1 : vector<1x512xf32> to vector<7x512xf32>
    %147 = arith.mulf %145, %146 : vector<7x512xf32>
    %148 = vector.broadcast %2 : vector<1x512xf32> to vector<7x512xf32>
    %149 = arith.addf %147, %148 : vector<7x512xf32>
    %cst_34 = arith.constant dense<0.000000e+00> : vector<7x512xf32>
    %150 = tpu.matmul %142, %0, %cst_34 {dimension_numbers = #tpu.dot_dimension_numbers<[1], [0], [0], [1], [0, 0, 1, 1], [], []>} : vector<7x10xf32>, vector<10x512xf32>, vector<7x512xf32> -> vector<7x512xf32>
    %151 = arith.addf %149, %150 : vector<7x512xf32>
    %152 = vector.extract_strided_slice %151 {offsets = [0, 0], sizes = [7, 10], strides = [1, 1]} : vector<7x512xf32> to vector<7x10xf32>
    %153 = arith.negf %152 : vector<7x10xf32>
    %154 = math.exp %153 : vector<7x10xf32>
    %cst_35 = arith.constant 1.000000e+00 : f32
    %155 = vector.broadcast %cst_35 : f32 to vector<7x10xf32>
    %156 = arith.addf %155, %154 : vector<7x10xf32>
    %157 = arith.divf %155, %156 : vector<7x10xf32>
    %158 = vector.extract_strided_slice %151 {offsets = [0, 128], sizes = [7, 10], strides = [1, 1]} : vector<7x512xf32> to vector<7x10xf32>
    %159 = arith.negf %158 : vector<7x10xf32>
    %160 = math.exp %159 : vector<7x10xf32>
    %cst_36 = arith.constant 1.000000e+00 : f32
    %161 = vector.broadcast %cst_36 : f32 to vector<7x10xf32>
    %162 = arith.addf %161, %160 : vector<7x10xf32>
    %163 = arith.divf %161, %162 : vector<7x10xf32>
    %164 = vector.extract_strided_slice %151 {offsets = [0, 256], sizes = [7, 10], strides = [1, 1]} : vector<7x512xf32> to vector<7x10xf32>
    %165 = math.tanh %164 : vector<7x10xf32>
    %166 = vector.extract_strided_slice %151 {offsets = [0, 384], sizes = [7, 10], strides = [1, 1]} : vector<7x512xf32> to vector<7x10xf32>
    %167 = arith.negf %166 : vector<7x10xf32>
    %168 = math.exp %167 : vector<7x10xf32>
    %cst_37 = arith.constant 1.000000e+00 : f32
    %169 = vector.broadcast %cst_37 : f32 to vector<7x10xf32>
    %170 = arith.addf %169, %168 : vector<7x10xf32>
    %171 = arith.divf %169, %170 : vector<7x10xf32>
    %172 = arith.mulf %163, %140 : vector<7x10xf32>
    %173 = arith.mulf %157, %165 : vector<7x10xf32>
    %174 = arith.addf %172, %173 : vector<7x10xf32>
    %175 = math.tanh %174 : vector<7x10xf32>
    %176 = arith.mulf %171, %175 : vector<7x10xf32>
    %c5 = arith.constant 5 : index
    %c0_38 = arith.constant 0 : index
    %c0_39 = arith.constant 0 : index
    %177 = vector.load %arg0[%c5, %c0_38, %c0_39] : memref<8x7x1xf32, #tpu.memory_space<vmem>>, vector<1x7x1xf32>
    %178 = vector.shape_cast %177 : vector<1x7x1xf32> to vector<7x1xf32>
    %179 = vector.broadcast %178 : vector<7x1xf32> to vector<7x512xf32>
    %180 = vector.broadcast %1 : vector<1x512xf32> to vector<7x512xf32>
    %181 = arith.mulf %179, %180 : vector<7x512xf32>
    %182 = vector.broadcast %2 : vector<1x512xf32> to vector<7x512xf32>
    %183 = arith.addf %181, %182 : vector<7x512xf32>
    %cst_40 = arith.constant dense<0.000000e+00> : vector<7x512xf32>
    %184 = tpu.matmul %176, %0, %cst_40 {dimension_numbers = #tpu.dot_dimension_numbers<[1], [0], [0], [1], [0, 0, 1, 1], [], []>} : vector<7x10xf32>, vector<10x512xf32>, vector<7x512xf32> -> vector<7x512xf32>
    %185 = arith.addf %183, %184 : vector<7x512xf32>
    %186 = vector.extract_strided_slice %185 {offsets = [0, 0], sizes = [7, 10], strides = [1, 1]} : vector<7x512xf32> to vector<7x10xf32>
    %187 = arith.negf %186 : vector<7x10xf32>
    %188 = math.exp %187 : vector<7x10xf32>
    %cst_41 = arith.constant 1.000000e+00 : f32
    %189 = vector.broadcast %cst_41 : f32 to vector<7x10xf32>
    %190 = arith.addf %189, %188 : vector<7x10xf32>
    %191 = arith.divf %189, %190 : vector<7x10xf32>
    %192 = vector.extract_strided_slice %185 {offsets = [0, 128], sizes = [7, 10], strides = [1, 1]} : vector<7x512xf32> to vector<7x10xf32>
    %193 = arith.negf %192 : vector<7x10xf32>
    %194 = math.exp %193 : vector<7x10xf32>
    %cst_42 = arith.constant 1.000000e+00 : f32
    %195 = vector.broadcast %cst_42 : f32 to vector<7x10xf32>
    %196 = arith.addf %195, %194 : vector<7x10xf32>
    %197 = arith.divf %195, %196 : vector<7x10xf32>
    %198 = vector.extract_strided_slice %185 {offsets = [0, 256], sizes = [7, 10], strides = [1, 1]} : vector<7x512xf32> to vector<7x10xf32>
    %199 = math.tanh %198 : vector<7x10xf32>
    %200 = vector.extract_strided_slice %185 {offsets = [0, 384], sizes = [7, 10], strides = [1, 1]} : vector<7x512xf32> to vector<7x10xf32>
    %201 = arith.negf %200 : vector<7x10xf32>
    %202 = math.exp %201 : vector<7x10xf32>
    %cst_43 = arith.constant 1.000000e+00 : f32
    %203 = vector.broadcast %cst_43 : f32 to vector<7x10xf32>
    %204 = arith.addf %203, %202 : vector<7x10xf32>
    %205 = arith.divf %203, %204 : vector<7x10xf32>
    %206 = arith.mulf %197, %174 : vector<7x10xf32>
    %207 = arith.mulf %191, %199 : vector<7x10xf32>
    %208 = arith.addf %206, %207 : vector<7x10xf32>
    %209 = math.tanh %208 : vector<7x10xf32>
    %210 = arith.mulf %205, %209 : vector<7x10xf32>
    %c6 = arith.constant 6 : index
    %c0_44 = arith.constant 0 : index
    %c0_45 = arith.constant 0 : index
    %211 = vector.load %arg0[%c6, %c0_44, %c0_45] : memref<8x7x1xf32, #tpu.memory_space<vmem>>, vector<1x7x1xf32>
    %212 = vector.shape_cast %211 : vector<1x7x1xf32> to vector<7x1xf32>
    %213 = vector.broadcast %212 : vector<7x1xf32> to vector<7x512xf32>
    %214 = vector.broadcast %1 : vector<1x512xf32> to vector<7x512xf32>
    %215 = arith.mulf %213, %214 : vector<7x512xf32>
    %216 = vector.broadcast %2 : vector<1x512xf32> to vector<7x512xf32>
    %217 = arith.addf %215, %216 : vector<7x512xf32>
    %cst_46 = arith.constant dense<0.000000e+00> : vector<7x512xf32>
    %218 = tpu.matmul %210, %0, %cst_46 {dimension_numbers = #tpu.dot_dimension_numbers<[1], [0], [0], [1], [0, 0, 1, 1], [], []>} : vector<7x10xf32>, vector<10x512xf32>, vector<7x512xf32> -> vector<7x512xf32>
    %219 = arith.addf %217, %218 : vector<7x512xf32>
    %220 = vector.extract_strided_slice %219 {offsets = [0, 0], sizes = [7, 10], strides = [1, 1]} : vector<7x512xf32> to vector<7x10xf32>
    %221 = arith.negf %220 : vector<7x10xf32>
    %222 = math.exp %221 : vector<7x10xf32>
    %cst_47 = arith.constant 1.000000e+00 : f32
    %223 = vector.broadcast %cst_47 : f32 to vector<7x10xf32>
    %224 = arith.addf %223, %222 : vector<7x10xf32>
    %225 = arith.divf %223, %224 : vector<7x10xf32>
    %226 = vector.extract_strided_slice %219 {offsets = [0, 128], sizes = [7, 10], strides = [1, 1]} : vector<7x512xf32> to vector<7x10xf32>
    %227 = arith.negf %226 : vector<7x10xf32>
    %228 = math.exp %227 : vector<7x10xf32>
    %cst_48 = arith.constant 1.000000e+00 : f32
    %229 = vector.broadcast %cst_48 : f32 to vector<7x10xf32>
    %230 = arith.addf %229, %228 : vector<7x10xf32>
    %231 = arith.divf %229, %230 : vector<7x10xf32>
    %232 = vector.extract_strided_slice %219 {offsets = [0, 256], sizes = [7, 10], strides = [1, 1]} : vector<7x512xf32> to vector<7x10xf32>
    %233 = math.tanh %232 : vector<7x10xf32>
    %234 = vector.extract_strided_slice %219 {offsets = [0, 384], sizes = [7, 10], strides = [1, 1]} : vector<7x512xf32> to vector<7x10xf32>
    %235 = arith.negf %234 : vector<7x10xf32>
    %236 = math.exp %235 : vector<7x10xf32>
    %cst_49 = arith.constant 1.000000e+00 : f32
    %237 = vector.broadcast %cst_49 : f32 to vector<7x10xf32>
    %238 = arith.addf %237, %236 : vector<7x10xf32>
    %239 = arith.divf %237, %238 : vector<7x10xf32>
    %240 = arith.mulf %231, %208 : vector<7x10xf32>
    %241 = arith.mulf %225, %233 : vector<7x10xf32>
    %242 = arith.addf %240, %241 : vector<7x10xf32>
    %243 = math.tanh %242 : vector<7x10xf32>
    %244 = arith.mulf %239, %243 : vector<7x10xf32>
    %c7 = arith.constant 7 : index
    %c0_50 = arith.constant 0 : index
    %c0_51 = arith.constant 0 : index
    %245 = vector.load %arg0[%c7, %c0_50, %c0_51] : memref<8x7x1xf32, #tpu.memory_space<vmem>>, vector<1x7x1xf32>
    %246 = vector.shape_cast %245 : vector<1x7x1xf32> to vector<7x1xf32>
    %247 = vector.broadcast %246 : vector<7x1xf32> to vector<7x512xf32>
    %248 = vector.broadcast %1 : vector<1x512xf32> to vector<7x512xf32>
    %249 = arith.mulf %247, %248 : vector<7x512xf32>
    %250 = vector.broadcast %2 : vector<1x512xf32> to vector<7x512xf32>
    %251 = arith.addf %249, %250 : vector<7x512xf32>
    %cst_52 = arith.constant dense<0.000000e+00> : vector<7x512xf32>
    %252 = tpu.matmul %244, %0, %cst_52 {dimension_numbers = #tpu.dot_dimension_numbers<[1], [0], [0], [1], [0, 0, 1, 1], [], []>} : vector<7x10xf32>, vector<10x512xf32>, vector<7x512xf32> -> vector<7x512xf32>
    %253 = arith.addf %251, %252 : vector<7x512xf32>
    %254 = vector.extract_strided_slice %253 {offsets = [0, 0], sizes = [7, 10], strides = [1, 1]} : vector<7x512xf32> to vector<7x10xf32>
    %255 = arith.negf %254 : vector<7x10xf32>
    %256 = math.exp %255 : vector<7x10xf32>
    %cst_53 = arith.constant 1.000000e+00 : f32
    %257 = vector.broadcast %cst_53 : f32 to vector<7x10xf32>
    %258 = arith.addf %257, %256 : vector<7x10xf32>
    %259 = arith.divf %257, %258 : vector<7x10xf32>
    %260 = vector.extract_strided_slice %253 {offsets = [0, 128], sizes = [7, 10], strides = [1, 1]} : vector<7x512xf32> to vector<7x10xf32>
    %261 = arith.negf %260 : vector<7x10xf32>
    %262 = math.exp %261 : vector<7x10xf32>
    %cst_54 = arith.constant 1.000000e+00 : f32
    %263 = vector.broadcast %cst_54 : f32 to vector<7x10xf32>
    %264 = arith.addf %263, %262 : vector<7x10xf32>
    %265 = arith.divf %263, %264 : vector<7x10xf32>
    %266 = vector.extract_strided_slice %253 {offsets = [0, 256], sizes = [7, 10], strides = [1, 1]} : vector<7x512xf32> to vector<7x10xf32>
    %267 = math.tanh %266 : vector<7x10xf32>
    %268 = vector.extract_strided_slice %253 {offsets = [0, 384], sizes = [7, 10], strides = [1, 1]} : vector<7x512xf32> to vector<7x10xf32>
    %269 = arith.negf %268 : vector<7x10xf32>
    %270 = math.exp %269 : vector<7x10xf32>
    %cst_55 = arith.constant 1.000000e+00 : f32
    %271 = vector.broadcast %cst_55 : f32 to vector<7x10xf32>
    %272 = arith.addf %271, %270 : vector<7x10xf32>
    %273 = arith.divf %271, %272 : vector<7x10xf32>
    %274 = arith.mulf %265, %242 : vector<7x10xf32>
    %275 = arith.mulf %259, %267 : vector<7x10xf32>
    %276 = arith.addf %274, %275 : vector<7x10xf32>
    %277 = math.tanh %276 : vector<7x10xf32>
    %278 = arith.mulf %273, %277 : vector<7x10xf32>
    %279 = vector.broadcast %3 : vector<1x10xf32> to vector<7x10xf32>
    %280 = arith.mulf %278, %279 : vector<7x10xf32>
    %cst_56 = arith.constant dense<0.000000e+00> : vector<7xf32>
    %281 = vector.multi_reduction <add>, %280, %cst_56 [1] : vector<7x10xf32> to vector<7xf32>
    %282 = vector.shape_cast %281 : vector<7xf32> to vector<7x1xf32>
    %283 = vector.broadcast %4 : vector<1x1xf32> to vector<7x1xf32>
    %284 = arith.addf %282, %283 : vector<7x1xf32>
    %c0_57 = arith.constant 0 : index
    %c0_58 = arith.constant 0 : index
    %285 = vector.load %arg2[%c0_57, %c0_58] : memref<7x1xf32, #tpu.memory_space<vmem>>, vector<7x1xf32>
    tpu.vector_store %arg2[%c0_57, %c0_58], %284 {strides = array<i32>} : memref<7x1xf32, #tpu.memory_space<vmem>>, vector<7x1xf32>,
    return
  }
}

</mosaic_0001>

<bundles_post_ra>
// kernel: recurrent_nn_forward.1
= control target key start
LH: loop header
LB: loop body
LE: loop exit
PB: predicated region body
PF: predicated region fallthrough
CT: control target
= control target key end

     0   :  { %vm84_vm0 = vcmask 1041408   ;;  %vm1908_vm1 = vmmov 1   ;;  %v1909_v3 = vmov 0.0   ;;  %v1910_v8 = vmov 0   ;;  %s1911_s18 = smov 118   ;;  %s2207_s1 = inlined_call_operand.vmem [shape: f32[13,512], index: 1, kind: input, shape index: {}]   ;;  %s2208_s0 = inlined_call_operand.vmem [shape: f32[8,7,1], index: 0, kind: input, shape index: {}]   ;;  %s2209_s2 = inlined_call_operand.vmem [shape: f32[7,1], index: 2, kind: output, shape index: {}]  }
   0x1   :  { %v12_v0 = vld [vmem:[%s2207_s1 + $0x8] sm:$0xff]  ;;  %vm1933_vm2 = vmpackc.low %vm84_vm0, %vm1908_vm1  ;;  %161 = vmatprep.mubr.f32.mxu0 %v1909_v3  ;;  %232 = vmatprep.mubr.f32.mxu1 %v1909_v3  ;;  %v14_v5 = vld [vmem:[%s2207_s1 + $0x18] sm:$0xff]  ;;  %v31_v19 = vlaneseq  ;;  %vm80_vm3 = vcmask 80896   ;;  %vm1584_vm4 = vcmask 79872   ;;  %vm1593_vm5 = vcmask 6144  }
   0x2   :  { %v16_v1 = vld [vmem:[%s2207_s1 + $0x28] sm:$0x3]  ;;  %v18_v6 = vld [vmem:[%s2207_s1 + $0x38] sm:$0x3]  ;;  %v11_v7 = vld [vmem:[%s2207_s1] sm:$0xff]  ;;  %1778 = vset.pattern.permute.xlu0 %v1910_v8  ;;  %1779 = vset.pattern.permute.xlu1 %v1910_v8 }
   0x3   :  { %v1939_v4 = vpack.c.bf16 %v16_v1, %v12_v0  ;;  %v1950_v9 = vpack.c.bf16 %v18_v6, %v14_v5  ;;  %v15_v10 = vld [vmem:[%s2207_s1 + $0x20] sm:$0x3]  ;;  %v13_v11 = vld [vmem:[%s2207_s1 + $0x10] sm:$0xff]  ;;  %v1608_v16 = vld [vmem:[%s2208_s0 + $0x8] sm:$0x7f]  ;;  %v32_v20 = vshrl.u32 %v31_v19, 7 }
   0x4   :  { %v17_v12 = vld [vmem:[%s2207_s1 + $0x30] sm:$0x3]  ;;  %v1964_v13 = vpack.c.bf16 %v15_v10, %v11_v7  ;;  %v24_v15 = vld [vmem:[%s2208_s0] sm:$0x7f] }
   0x5   :  { %1680 = vmatprep.subr.msk.bf16.mxu0 %vm1933_vm2, %v1939_v4  ;;  %v1966_v14 = vpack.c.bf16 %v17_v12, %v13_v11  ;;  %1686 = vmatprep.subr.msk.bf16.mxu1 %vm1933_vm2, %v1950_v9  ;;  %v1638_v17 = vld [vmem:[%s2208_s0 + $0x20] sm:$0x7f]  ;;  %v1658_v18 = vld [vmem:[%s2208_s0 + $0x30] sm:$0x7f]  ;;  %v33_v21 = vsub.s32 0, %v32_v20  ;;  %v37_v23 = vsub.s32 1, %v32_v20 }
   0x6   :  { %27 = vperm.xlu0 %1778, %v24_v15   ;;  %1683 = vmatpush1.bf16.msk.msra.mxu0 %vm1933_vm2, %v1964_v13  ;;  %v1599_v22 = vld [vmem:[%s2207_s1 + $0x22] ss:$8 sm:$0xf]  ;;  %v1600_v25 = vld [vmem:[%s2207_s1 + $0x23] ss:$8 sm:$0xf] }
   0x7   :  { %1689 = vmatpush1.bf16.msk.msra.mxu1 %vm1933_vm2, %v1966_v14  ;;  %1692 = vmatprep.subr.msk.bf16.mxu0 %vm1933_vm2, %v1939_v4  ;;  %v2014_v24 = vrot.slane %v1599_v22, %v33_v21  ;;  %v2019_v26 = vrot.slane %v1599_v22, %v37_v23  ;;  %v45_v28 = vsub.s32 3, %v32_v20  ;;  %v2022_v30 = vrot.slane %v1600_v25, %v33_v21  ;;  %v1618_v10 = vld [vmem:[%s2208_s0 + $0x10] sm:$0x7f]  ;;  %v1628_v11 = vld [vmem:[%s2208_s0 + $0x18] sm:$0x7f] }
   0x8   :  { %1698 = vmatprep.subr.msk.bf16.mxu1 %vm1933_vm2, %v1950_v9  ;;  %v2025_v32 = vrot.slane %v1600_v25, %v37_v23  ;;  %v41_v35 = vsub.s32 2, %v32_v20  ;;  %459 = vperm.xlu1 %1779, %v1618_v10   ;;  %v1648_v12 = vld [vmem:[%s2208_s0 + $0x28] sm:$0x7f]  ;;  %v1668_v15 = vld [vmem:[%s2208_s0 + $0x38] sm:$0x7f] }
   0x9   :  { %162 = vmatmul.mubr.f32.vlgmr.msra.gmra.mrb[0].mxu0 %v1909_v3  ;;  %v2027_v33 = vrot.slane %v1599_v22, %v45_v28  ;;  %v2032_v40 = vrot.slane %v1600_v25, %v45_v28 }
   0xa   :  { %233 = vmatmul.mubr.f32.vlgmr.msra.gmra.mrb[0].mxu1 %v1909_v3  ;;  %271 = vperm.xlu0 %1778, %v1608_v16   ;;  %v2034_v42 = vrot.slane %v1599_v22, %v41_v35  ;;  %v2038_v50 = vrot.slane %v1600_v25, %v41_v35 }
   0xb   :  { %1695 = vmatpush1.bf16.msk.msra.mxu0 %vm1933_vm2, %v1964_v13  ;;  %1701 = vmatpush1.bf16.msk.msra.mxu1 %vm1933_vm2, %v1966_v14 }
   0xc   :  { %349 = vmatprep.mubr.f32.mxu0 %v1909_v3  ;;  %420 = vmatprep.mubr.f32.mxu1 %v1909_v3 }
   0xd   :  { %1704 = vmatprep.subr.msk.bf16.mxu0 %vm1933_vm2, %v1939_v4  ;;  %1710 = vmatprep.subr.msk.bf16.mxu1 %vm1933_vm2, %v1950_v9 }
   0xe   :  { %835 = vperm.xlu0 %1778, %v1638_v17   ;;  %647 = vperm.xlu1 %1779, %v1628_v11  }
  0x12   :  { %1211 = vperm.xlu0 %1778, %v1658_v18   ;;  %1023 = vperm.xlu1 %1779, %v1648_v12  }
  0x16   :  { %1399 = vperm.xlu1 %1779, %v1668_v15  }
  0x85   :  { %v28_v27 = vpop.permute.xlu0 %27 }
  0x86   :  { %v51_v29 = vmul.f32 %v2014_v24, %v28_v27  ;;  %v52_v31 = vmul.f32 %v2019_v26, %v28_v27  ;;  %v54_v39 = vmul.f32 %v2027_v33, %v28_v27  ;;  %v53_v49 = vmul.f32 %v2034_v42, %v28_v27 }
  0x88   :  { %v76_v34 = vadd.f32 %v2022_v30, %v51_v29  ;;  %v77_v36 = vadd.f32 %v2025_v32, %v52_v31  ;;  %v79_v48 = vadd.f32 %v2032_v40, %v54_v39  ;;  %v78_v52 = vadd.f32 %v2038_v50, %v53_v49 }
  0x89   :  { %v272_v16 = vpop.permute.xlu0 %271 }
  0x8a   :  { %v274_v17 = vmul.f32 %v272_v16, %v2014_v24  ;;  %v275_v18 = vmul.f32 %v272_v16, %v2019_v26  ;;  %v277_v29 = vmul.f32 %v272_v16, %v2027_v33 }
  0x8c   :  { %v278_v19 = vadd.f32 %v274_v17, %v2022_v30  ;;  %v279_v22 = vadd.f32 %v275_v18, %v2025_v32  ;;  %v281_v35 = vadd.f32 %v277_v29, %v2032_v40 }
  0xdc   :  { %v163_v37 = vpop.f32.mrb[0].mxu0 }
  0xdd   :  { %v234_v38 = vpop.f32.mrb[0].mxu1  ;;  %v239_v41 = vadd.f32 %v163_v37, %v76_v34  ;;  %v165_v43 = vpop.f32.mrb[1].mxu0 }
  0xde   :  { %v236_v44 = vpop.f32.mrb[1].mxu1  ;;  %v240_v45 = vadd.f32 %v165_v43, %v77_v36  ;;  %v241_v54 = vadd.f32 %v234_v38, %v78_v52  ;;  %v276_v36 = vmul.f32 %v272_v16, %v2034_v42 }
  0xdf   :  { %v1605_v46 = vmul.f32 -1.442695, %v239_v41  ;;  %v242_v51 = vadd.f32 %v236_v44, %v79_v48 }
  0xe0   :  { %v1606_v47 = vmul.f32 -1.442695, %v240_v45  ;;  %v280_v38 = vadd.f32 %v276_v36, %v2038_v50 }
  0xe1   :  { %1780 = vpow2.f32 %v1605_v46  ;;  %v1607_v53 = vmul.f32 -1.442695, %v242_v51 }
  0xe2   :  { %1782 = vpow2.f32 %v1606_v47 }
  0xe3   :  { %1784 = vpow2.f32 %v1607_v53 }
  0xe4   :  { %1786 = vtanh.f32 %v241_v54 }
  0xeb   :  { %v1781_v55 = vpop.eup %1780 }
  0xec   :  { %v1783_v56 = vpop.eup %1782  ;;  %v246_v57 = vadd.f32 1.0, %v1781_v55 }
  0xed   :  { %v252_v58 = vadd.f32 1.0, %v1783_v56  ;;  %v1785_v59 = vpop.eup %1784 }
  0xee   :  { %1788 = vrcp.f32 %v246_v57  ;;  %v1787_v60 = vpop.eup %1786  ;;  %v259_v0 = vadd.f32 1.0, %v1785_v59  ;;  %v460_v59 = vpop.permute.xlu1 %459 }
  0xef   :  { %1790 = vrcp.f32 %v252_v58  ;;  %v464_v16 = vmul.f32 %v460_v59, %v2034_v42 }
  0xf0   :  { %1792 = vrcp.f32 %v259_v0 }
  0xf1   :  { %v468_v18 = vadd.f32 %v464_v16, %v2038_v50 }
  0xf8   :  { %v1789_v61 = vpop.eup %1788 }
  0xf9   :  { %v1791_v62 = vpop.eup %1790  ;;  %v263_v63 = vmul.f32 %v1789_v61, %v1787_v60  ;;  %v462_v60 = vmul.f32 %v460_v59, %v2014_v24  ;;  %v463_v61 = vmul.f32 %v460_v59, %v2019_v26 }
  0xfa   :  { %v262_v1 = vmul.f32 0.0, %v1791_v62  ;;  %v1793_v6 = vpop.eup %1792 }
  0xfb   :  { %v466_v62 = vadd.f32 %v462_v60, %v2022_v30 }
  0xfc   :  { %v264_v5 = vadd.f32 %v263_v63, %v262_v1  ;;  %v467_v63 = vadd.f32 %v463_v61, %v2025_v32 }
  0xfe   :  { %1794 = vtanh.f32 %v264_v5 }
 0x108   :  { %v1795_v7 = vpop.eup %1794 }
 0x109   :  { %v266_v8 = vmul.f32 %v1795_v7, %v1793_v6 }
 0x10b   :  { %1611 = vmatmul.mubr.msk.f32.vlgmr.msra.gmra.mrb[2].mxu0 %vm80_vm3, %v266_v8  ;;  %1614 = vmatmul.mubr.msk.f32.vlgmr.msra.gmra.mrb[2].mxu1 %vm80_vm3, %v266_v8 }
 0x10c   :  { %1707 = vmatpush1.bf16.msk.msra.mxu0 %vm1933_vm2, %v1964_v13  ;;  %1713 = vmatpush1.bf16.msk.msra.mxu1 %vm1933_vm2, %v1966_v14 }
 0x10d   :  { %537 = vmatprep.mubr.f32.mxu0 %v1909_v3  ;;  %608 = vmatprep.mubr.f32.mxu1 %v1909_v3 }
 0x10e   :  { %1716 = vmatprep.subr.msk.bf16.mxu0 %vm1933_vm2, %v1939_v4  ;;  %1722 = vmatprep.subr.msk.bf16.mxu1 %vm1933_vm2, %v1950_v9 }
 0x1de   :  { %v351_v20 = vpop.f32.mrb[2].mxu0  ;;  %v422_v21 = vpop.f32.mrb[2].mxu1 }
 0x1df   :  { %v427_v23 = vadd.f32 %v351_v20, %v278_v19  ;;  %v353_v25 = vpop.f32.mrb[3].mxu0  ;;  %v424_v27 = vpop.f32.mrb[3].mxu1  ;;  %v429_v41 = vadd.f32 %v422_v21, %v280_v38 }
 0x1e0   :  { %v428_v28 = vadd.f32 %v353_v25, %v279_v22  ;;  %v430_v37 = vadd.f32 %v424_v27, %v281_v35 }
 0x1e1   :  { %v1615_v31 = vmul.f32 -1.442695, %v427_v23 }
 0x1e2   :  { %v1616_v34 = vmul.f32 -1.442695, %v428_v28  ;;  %v1617_v39 = vmul.f32 -1.442695, %v430_v37 }
 0x1e3   :  { %1796 = vpow2.f32 %v1615_v31 }
 0x1e4   :  { %1798 = vpow2.f32 %v1616_v34 }
 0x1e5   :  { %1800 = vpow2.f32 %v1617_v39 }
 0x1e6   :  { %1802 = vtanh.f32 %v429_v41 }
 0x1ed   :  { %v1797_v43 = vpop.eup %1796 }
 0x1ee   :  { %v1799_v44 = vpop.eup %1798  ;;  %v434_v45 = vadd.f32 1.0, %v1797_v43  ;;  %v648_v43 = vpop.permute.xlu1 %647 }
 0x1ef   :  { %v440_v46 = vadd.f32 1.0, %v1799_v44  ;;  %v1801_v47 = vpop.eup %1800  ;;  %v650_v44 = vmul.f32 %v648_v43, %v2014_v24 }
 0x1f0   :  { %1804 = vrcp.f32 %v434_v45  ;;  %v1803_v48 = vpop.eup %1802  ;;  %v447_v53 = vadd.f32 1.0, %v1801_v47  ;;  %v651_v45 = vmul.f32 %v648_v43, %v2019_v26 }
 0x1f1   :  { %1806 = vrcp.f32 %v440_v46  ;;  %v654_v46 = vadd.f32 %v650_v44, %v2022_v30 }
 0x1f2   :  { %1808 = vrcp.f32 %v447_v53 }
 0x1fa   :  { %v1805_v49 = vpop.eup %1804 }
 0x1fb   :  { %v1807_v51 = vpop.eup %1806  ;;  %v451_v52 = vmul.f32 %v1805_v49, %v1803_v48  ;;  %v655_v49 = vadd.f32 %v651_v45, %v2025_v32 }
 0x1fc   :  { %v450_v54 = vmul.f32 %v1807_v51, %v264_v5  ;;  %v1809_v56 = vpop.eup %1808  ;;  %v465_v5 = vmul.f32 %v460_v59, %v2027_v33  ;;  %v652_v59 = vmul.f32 %v648_v43, %v2034_v42 }
 0x1fe   :  { %v452_v55 = vadd.f32 %v451_v52, %v450_v54  ;;  %v469_v15 = vadd.f32 %v465_v5, %v2032_v40  ;;  %v656_v61 = vadd.f32 %v652_v59, %v2038_v50 }
 0x200   :  { %1810 = vtanh.f32 %v452_v55 }
 0x20a   :  { %v1811_v57 = vpop.eup %1810 }
 0x20b   :  { %v454_v58 = vmul.f32 %v1811_v57, %v1809_v56 }
 0x20d   :  { %1621 = vmatmul.mubr.msk.f32.vlgmr.msra.gmra.mrb[4].mxu0 %vm80_vm3, %v454_v58  ;;  %1624 = vmatmul.mubr.msk.f32.vlgmr.msra.gmra.mrb[4].mxu1 %vm80_vm3, %v454_v58 }
 0x20e   :  { %1719 = vmatpush1.bf16.msk.msra.mxu0 %vm1933_vm2, %v1964_v13  ;;  %1725 = vmatpush1.bf16.msk.msra.mxu1 %vm1933_vm2, %v1966_v14 }
 0x20f   :  { %725 = vmatprep.mubr.f32.mxu0 %v1909_v3  ;;  %796 = vmatprep.mubr.f32.mxu1 %v1909_v3 }
 0x210   :  { %1728 = vmatprep.subr.msk.bf16.mxu0 %vm1933_vm2, %v1939_v4  ;;  %1734 = vmatprep.subr.msk.bf16.mxu1 %vm1933_vm2, %v1950_v9 }
 0x2e0   :  { %v539_v0 = vpop.f32.mrb[4].mxu0  ;;  %v610_v1 = vpop.f32.mrb[4].mxu1 }
 0x2e1   :  { %v615_v6 = vadd.f32 %v539_v0, %v466_v62  ;;  %v541_v7 = vpop.f32.mrb[5].mxu0  ;;  %v612_v8 = vpop.f32.mrb[5].mxu1  ;;  %v617_v20 = vadd.f32 %v610_v1, %v468_v18 }
 0x2e2   :  { %v616_v10 = vadd.f32 %v541_v7, %v467_v63  ;;  %v618_v17 = vadd.f32 %v612_v8, %v469_v15 }
 0x2e3   :  { %v1625_v11 = vmul.f32 -1.442695, %v615_v6 }
 0x2e4   :  { %v1626_v12 = vmul.f32 -1.442695, %v616_v10  ;;  %v1627_v19 = vmul.f32 -1.442695, %v618_v17 }
 0x2e5   :  { %1812 = vpow2.f32 %v1625_v11 }
 0x2e6   :  { %1814 = vpow2.f32 %v1626_v12 }
 0x2e7   :  { %1816 = vpow2.f32 %v1627_v19 }
 0x2e8   :  { %1818 = vtanh.f32 %v617_v20 }
 0x2ef   :  { %v1813_v21 = vpop.eup %1812 }
 0x2f0   :  { %v1815_v22 = vpop.eup %1814  ;;  %v622_v23 = vadd.f32 1.0, %v1813_v21  ;;  %v836_v21 = vpop.permute.xlu0 %835 }
 0x2f1   :  { %v628_v25 = vadd.f32 1.0, %v1815_v22  ;;  %v1817_v27 = vpop.eup %1816  ;;  %v838_v22 = vmul.f32 %v836_v21, %v2014_v24 }
 0x2f2   :  { %1820 = vrcp.f32 %v622_v23  ;;  %v1819_v28 = vpop.eup %1818  ;;  %v635_v35 = vadd.f32 1.0, %v1817_v27  ;;  %v839_v23 = vmul.f32 %v836_v21, %v2019_v26 }
 0x2f3   :  { %1822 = vrcp.f32 %v628_v25  ;;  %v842_v25 = vadd.f32 %v838_v22, %v2022_v30 }
 0x2f4   :  { %1824 = vrcp.f32 %v635_v35 }
 0x2fc   :  { %v1821_v29 = vpop.eup %1820 }
 0x2fd   :  { %v1823_v31 = vpop.eup %1822  ;;  %v639_v34 = vmul.f32 %v1821_v29, %v1819_v28  ;;  %v843_v29 = vadd.f32 %v839_v23, %v2025_v32 }
 0x2fe   :  { %v638_v36 = vmul.f32 %v1823_v31, %v452_v55  ;;  %v1825_v38 = vpop.eup %1824  ;;  %v653_v55 = vmul.f32 %v648_v43, %v2027_v33  ;;  %v840_v43 = vmul.f32 %v836_v21, %v2034_v42 }
 0x300   :  { %v640_v37 = vadd.f32 %v639_v34, %v638_v36  ;;  %v657_v58 = vadd.f32 %v653_v55, %v2032_v40  ;;  %v844_v45 = vadd.f32 %v840_v43, %v2038_v50 }
 0x302   :  { %1826 = vtanh.f32 %v640_v37 }
 0x30c   :  { %v1827_v39 = vpop.eup %1826 }
 0x30d   :  { %v642_v41 = vmul.f32 %v1827_v39, %v1825_v38 }
 0x30f   :  { %1631 = vmatmul.mubr.msk.f32.vlgmr.msra.gmra.mrb[6].mxu0 %vm80_vm3, %v642_v41  ;;  %1634 = vmatmul.mubr.msk.f32.vlgmr.msra.gmra.mrb[6].mxu1 %vm80_vm3, %v642_v41 }
 0x310   :  { %1731 = vmatpush1.bf16.msk.msra.mxu0 %vm1933_vm2, %v1964_v13  ;;  %1737 = vmatpush1.bf16.msk.msra.mxu1 %vm1933_vm2, %v1966_v14 }
 0x311   :  { %913 = vmatprep.mubr.f32.mxu0 %v1909_v3  ;;  %984 = vmatprep.mubr.f32.mxu1 %v1909_v3 }
 0x312   :  { %1740 = vmatprep.subr.msk.bf16.mxu0 %vm1933_vm2, %v1939_v4  ;;  %1746 = vmatprep.subr.msk.bf16.mxu1 %vm1933_vm2, %v1950_v9 }
 0x3e2   :  { %v727_v47 = vpop.f32.mrb[6].mxu0  ;;  %v798_v48 = vpop.f32.mrb[6].mxu1 }
 0x3e3   :  { %v803_v51 = vadd.f32 %v727_v47, %v654_v46  ;;  %v729_v52 = vpop.f32.mrb[7].mxu0  ;;  %v800_v53 = vpop.f32.mrb[7].mxu1  ;;  %v805_v63 = vadd.f32 %v798_v48, %v656_v61 }
 0x3e4   :  { %v804_v54 = vadd.f32 %v729_v52, %v655_v49  ;;  %v806_v60 = vadd.f32 %v800_v53, %v657_v58 }
 0x3e5   :  { %v1635_v56 = vmul.f32 -1.442695, %v803_v51 }
 0x3e6   :  { %v1636_v57 = vmul.f32 -1.442695, %v804_v54  ;;  %v1637_v62 = vmul.f32 -1.442695, %v806_v60 }
 0x3e7   :  { %1828 = vpow2.f32 %v1635_v56 }
 0x3e8   :  { %1830 = vpow2.f32 %v1636_v57 }
 0x3e9   :  { %1832 = vpow2.f32 %v1637_v62 }
 0x3ea   :  { %1834 = vtanh.f32 %v805_v63 }
 0x3f1   :  { %v1829_v0 = vpop.eup %1828 }
 0x3f2   :  { %v1831_v1 = vpop.eup %1830  ;;  %v810_v5 = vadd.f32 1.0, %v1829_v0  ;;  %v1024_v0 = vpop.permute.xlu1 %1023 }
 0x3f3   :  { %v816_v6 = vadd.f32 1.0, %v1831_v1  ;;  %v1833_v7 = vpop.eup %1832  ;;  %v1026_v1 = vmul.f32 %v1024_v0, %v2014_v24 }
 0x3f4   :  { %1836 = vrcp.f32 %v810_v5  ;;  %v1835_v8 = vpop.eup %1834  ;;  %v823_v15 = vadd.f32 1.0, %v1833_v7  ;;  %v1027_v5 = vmul.f32 %v1024_v0, %v2019_v26 }
 0x3f5   :  { %1838 = vrcp.f32 %v816_v6  ;;  %v1030_v6 = vadd.f32 %v1026_v1, %v2022_v30 }
 0x3f6   :  { %1840 = vrcp.f32 %v823_v15 }
 0x3fe   :  { %v1837_v10 = vpop.eup %1836 }
 0x3ff   :  { %v1839_v11 = vpop.eup %1838  ;;  %v827_v12 = vmul.f32 %v1837_v10, %v1835_v8  ;;  %v1031_v10 = vadd.f32 %v1027_v5, %v2025_v32 }
 0x400   :  { %v826_v16 = vmul.f32 %v1839_v11, %v640_v37  ;;  %v1841_v18 = vpop.eup %1840  ;;  %v841_v37 = vmul.f32 %v836_v21, %v2027_v33 }
 0x402   :  { %v828_v17 = vadd.f32 %v827_v12, %v826_v16  ;;  %v845_v41 = vadd.f32 %v841_v37, %v2032_v40 }
 0x404   :  { %1842 = vtanh.f32 %v828_v17 }
 0x40e   :  { %v1843_v19 = vpop.eup %1842 }
 0x40f   :  { %v830_v20 = vmul.f32 %v1843_v19, %v1841_v18  ;;  %v1028_v19 = vmul.f32 %v1024_v0, %v2034_v42 }
 0x411   :  { %1641 = vmatmul.mubr.msk.f32.vlgmr.msra.gmra.mrb[8].mxu0 %vm80_vm3, %v830_v20  ;;  %1644 = vmatmul.mubr.msk.f32.vlgmr.msra.gmra.mrb[8].mxu1 %vm80_vm3, %v830_v20  ;;  %v1032_v21 = vadd.f32 %v1028_v19, %v2038_v50 }
 0x412   :  { %1743 = vmatpush1.bf16.msk.msra.mxu0 %vm1933_vm2, %v1964_v13  ;;  %1749 = vmatpush1.bf16.msk.msra.mxu1 %vm1933_vm2, %v1966_v14 }
 0x413   :  { %1101 = vmatprep.mubr.f32.mxu0 %v1909_v3  ;;  %1172 = vmatprep.mubr.f32.mxu1 %v1909_v3 }
 0x414   :  { %1752 = vmatprep.subr.msk.bf16.mxu0 %vm1933_vm2, %v1939_v4  ;;  %1758 = vmatprep.subr.msk.bf16.mxu1 %vm1933_vm2, %v1950_v9 }
 0x4e4   :  { %v915_v27 = vpop.f32.mrb[8].mxu0  ;;  %v986_v28 = vpop.f32.mrb[8].mxu1 }
 0x4e5   :  { %v991_v31 = vadd.f32 %v915_v27, %v842_v25  ;;  %v917_v34 = vpop.f32.mrb[9].mxu0  ;;  %v988_v35 = vpop.f32.mrb[9].mxu1  ;;  %v993_v47 = vadd.f32 %v986_v28, %v844_v45 }
 0x4e6   :  { %v992_v36 = vadd.f32 %v917_v34, %v843_v29  ;;  %v994_v44 = vadd.f32 %v988_v35, %v845_v41 }
 0x4e7   :  { %v1645_v38 = vmul.f32 -1.442695, %v991_v31 }
 0x4e8   :  { %v1646_v39 = vmul.f32 -1.442695, %v992_v36  ;;  %v1647_v46 = vmul.f32 -1.442695, %v994_v44 }
 0x4e9   :  { %1844 = vpow2.f32 %v1645_v38 }
 0x4ea   :  { %1846 = vpow2.f32 %v1646_v39 }
 0x4eb   :  { %1848 = vpow2.f32 %v1647_v46  ;;  %v1212_v46 = vpop.permute.xlu0 %1211 }
 0x4ec   :  { %1850 = vtanh.f32 %v993_v47  ;;  %v1214_v47 = vmul.f32 %v1212_v46, %v2014_v24 }
 0x4f3   :  { %v1845_v48 = vpop.eup %1844 }
 0x4f4   :  { %v1847_v49 = vpop.eup %1846  ;;  %v998_v51 = vadd.f32 1.0, %v1845_v48  ;;  %v1215_v48 = vmul.f32 %v1212_v46, %v2019_v26 }
 0x4f5   :  { %v1004_v52 = vadd.f32 1.0, %v1847_v49  ;;  %v1849_v53 = vpop.eup %1848  ;;  %v1218_v49 = vadd.f32 %v1214_v47, %v2022_v30 }
 0x4f6   :  { %1852 = vrcp.f32 %v998_v51  ;;  %v1851_v54 = vpop.eup %1850  ;;  %v1011_v58 = vadd.f32 1.0, %v1849_v53  ;;  %v1219_v53 = vadd.f32 %v1215_v48, %v2025_v32 }
 0x4f7   :  { %1854 = vrcp.f32 %v1004_v52 }
 0x4f8   :  { %1856 = vrcp.f32 %v1011_v58  ;;  %v1216_v58 = vmul.f32 %v1212_v46, %v2034_v42 }
 0x500   :  { %v1853_v55 = vpop.eup %1852 }
 0x501   :  { %v1855_v56 = vpop.eup %1854  ;;  %v1015_v57 = vmul.f32 %v1853_v55, %v1851_v54 }
 0x502   :  { %v1014_v59 = vmul.f32 %v1855_v56, %v828_v17  ;;  %v1857_v61 = vpop.eup %1856 }
 0x504   :  { %v1016_v60 = vadd.f32 %v1015_v57, %v1014_v59 }
 0x506   :  { %1858 = vtanh.f32 %v1016_v60 }
 0x510   :  { %v1859_v62 = vpop.eup %1858 }
 0x511   :  { %v1018_v63 = vmul.f32 %v1859_v62, %v1857_v61 }
 0x513   :  { %1651 = vmatmul.mubr.msk.f32.vlgmr.msra.gmra.mrb[10].mxu0 %vm80_vm3, %v1018_v63  ;;  %1654 = vmatmul.mubr.msk.f32.vlgmr.msra.gmra.mrb[10].mxu1 %vm80_vm3, %v1018_v63 }
 0x514   :  { %1755 = vmatpush1.bf16.msk.msra.mxu0 %vm1933_vm2, %v1964_v13  ;;  %1761 = vmatpush1.bf16.msk.msra.mxu1 %vm1933_vm2, %v1966_v14 }
 0x515   :  { %1289 = vmatprep.mubr.f32.mxu0 %v1909_v3  ;;  %1360 = vmatprep.mubr.f32.mxu1 %v1909_v3 }
 0x516   :  { %1764 = vmatprep.subr.msk.bf16.mxu0 %vm1933_vm2, %v1939_v4  ;;  %1770 = vmatprep.subr.msk.bf16.mxu1 %vm1933_vm2, %v1950_v9  ;;  %v1029_v4 = vmul.f32 %v1024_v0, %v2027_v33 }
 0x518   :  { %v1033_v9 = vadd.f32 %v1029_v4, %v2032_v40 }
 0x5e6   :  { %v1103_v7 = vpop.f32.mrb[10].mxu0  ;;  %v1174_v8 = vpop.f32.mrb[10].mxu1 }
 0x5e7   :  { %v1179_v11 = vadd.f32 %v1103_v7, %v1030_v6  ;;  %v1105_v12 = vpop.f32.mrb[11].mxu0  ;;  %v1176_v15 = vpop.f32.mrb[11].mxu1  ;;  %v1181_v23 = vadd.f32 %v1174_v8, %v1032_v21 }
 0x5e8   :  { %v1180_v16 = vadd.f32 %v1105_v12, %v1031_v10  ;;  %v1182_v20 = vadd.f32 %v1176_v15, %v1033_v9  ;;  %v1400_v9 = vpop.permute.xlu1 %1399 }
 0x5e9   :  { %v1655_v17 = vmul.f32 -1.442695, %v1179_v11  ;;  %v1402_v19 = vmul.f32 %v1400_v9, %v2014_v24 }
 0x5ea   :  { %v1656_v18 = vmul.f32 -1.442695, %v1180_v16  ;;  %v1657_v22 = vmul.f32 -1.442695, %v1182_v20  ;;  %v1403_v20 = vmul.f32 %v1400_v9, %v2019_v26  ;;  %v1404_v26 = vmul.f32 %v1400_v9, %v2034_v42 }
 0x5eb   :  { %1860 = vpow2.f32 %v1655_v17  ;;  %v1406_v21 = vadd.f32 %v1402_v19, %v2022_v30 }
 0x5ec   :  { %1862 = vpow2.f32 %v1656_v18  ;;  %v1408_v30 = vadd.f32 %v1404_v26, %v2038_v50 }
 0x5ed   :  { %1864 = vpow2.f32 %v1657_v22 }
 0x5ee   :  { %1866 = vtanh.f32 %v1181_v23 }
 0x5f5   :  { %v1861_v25 = vpop.eup %1860 }
 0x5f6   :  { %v1863_v27 = vpop.eup %1862  ;;  %v1186_v28 = vadd.f32 1.0, %v1861_v25  ;;  %v1407_v25 = vadd.f32 %v1403_v20, %v2025_v32 }
 0x5f7   :  { %v1192_v29 = vadd.f32 1.0, %v1863_v27  ;;  %v1865_v31 = vpop.eup %1864 }
 0x5f8   :  { %1868 = vrcp.f32 %v1186_v28  ;;  %v1867_v34 = vpop.eup %1866  ;;  %v1199_v38 = vadd.f32 1.0, %v1865_v31 }
 0x5f9   :  { %1870 = vrcp.f32 %v1192_v29 }
 0x5fa   :  { %1872 = vrcp.f32 %v1199_v38 }
 0x602   :  { %v1869_v35 = vpop.eup %1868 }
 0x603   :  { %v1871_v36 = vpop.eup %1870  ;;  %v1203_v37 = vmul.f32 %v1869_v35, %v1867_v34  ;;  %v1405_v34 = vmul.f32 %v1400_v9, %v2027_v33 }
 0x604   :  { %v1202_v39 = vmul.f32 %v1871_v36, %v1016_v60  ;;  %v1873_v43 = vpop.eup %1872  ;;  %v1220_v60 = vadd.f32 %v1216_v58, %v2038_v50 }
 0x605   :  { %v1409_v24 = vadd.f32 %v1405_v34, %v2032_v40 }
 0x606   :  { %v1204_v41 = vadd.f32 %v1203_v37, %v1202_v39 }
 0x608   :  { %1874 = vtanh.f32 %v1204_v41 }
 0x612   :  { %v1875_v44 = vpop.eup %1874 }
 0x613   :  { %v1206_v45 = vmul.f32 %v1875_v44, %v1873_v43 }
 0x615   :  { %1661 = vmatmul.mubr.msk.f32.vlgmr.msra.gmra.mrb[12].mxu0 %vm80_vm3, %v1206_v45  ;;  %1664 = vmatmul.mubr.msk.f32.vlgmr.msra.gmra.mrb[12].mxu1 %vm80_vm3, %v1206_v45 }
 0x616   :  { %1767 = vmatpush1.bf16.msk.msra.mxu0 %vm1933_vm2, %v1964_v13  ;;  %1773 = vmatpush1.bf16.msk.msra.mxu1 %vm1933_vm2, %v1966_v14  ;;  %v1217_v14 = vmul.f32 %v1212_v46, %v2027_v33 }
 0x617   :  { %1477 = vmatprep.mubr.f32.mxu0 %v1909_v3  ;;  %1548 = vmatprep.mubr.f32.mxu1 %v1909_v3 }
 0x618   :  { %v1221_v3 = vadd.f32 %v1217_v14, %v2032_v40 }
 0x6e8   :  { %v1291_v51 = vpop.f32.mrb[12].mxu0  ;;  %v1362_v52 = vpop.f32.mrb[12].mxu1 }
 0x6e9   :  { %v1367_v13 = vadd.f32 %v1291_v51, %v1218_v49  ;;  %v1293_v54 = vpop.f32.mrb[13].mxu0  ;;  %v1364_v55 = vpop.f32.mrb[13].mxu1  ;;  %v1369_v62 = vadd.f32 %v1362_v52, %v1220_v60  ;;  %v23_v52 = vld [vmem:[%s2207_s1 + $0x24] ss:$0 sm:$0xff] }
 0x6ea   :  { %v1368_v2 = vadd.f32 %v1293_v54, %v1219_v53  ;;  %v1370_v59 = vadd.f32 %v1364_v55, %v1221_v3 }
 0x6eb   :  { %v1665_v56 = vmul.f32 -1.442695, %v1367_v13 }
 0x6ec   :  { %v1666_v57 = vmul.f32 -1.442695, %v1368_v2  ;;  %v1667_v61 = vmul.f32 -1.442695, %v1370_v59 }
 0x6ed   :  { %1876 = vpow2.f32 %v1665_v56 }
 0x6ee   :  { %1878 = vpow2.f32 %v1666_v57 }
 0x6ef   :  { %1880 = vpow2.f32 %v1667_v61 }
 0x6f0   :  { %1882 = vtanh.f32 %v1369_v62 }
 0x6f7   :  { %v1877_v63 = vpop.eup %1876 }
 0x6f8   :  { %v1879_v0 = vpop.eup %1878  ;;  %v1374_v1 = vadd.f32 1.0, %v1877_v63 }
 0x6f9   :  { %v1380_v5 = vadd.f32 1.0, %v1879_v0  ;;  %v1881_v6 = vpop.eup %1880 }
 0x6fa   :  { %1884 = vrcp.f32 %v1374_v1  ;;  %v1883_v7 = vpop.eup %1882  ;;  %v1387_v12 = vadd.f32 1.0, %v1881_v6 }
 0x6fb   :  { %1886 = vrcp.f32 %v1380_v5 }
 0x6fc   :  { %1888 = vrcp.f32 %v1387_v12 }
 0x704   :  { %v1885_v8 = vpop.eup %1884 }
 0x705   :  { %v1887_v10 = vpop.eup %1886  ;;  %v1391_v11 = vmul.f32 %v1885_v8, %v1883_v7 }
 0x706   :  { %v1390_v15 = vmul.f32 %v1887_v10, %v1204_v41  ;;  %v1889_v4 = vpop.eup %1888 }
 0x708   :  { %v1392_v16 = vadd.f32 %v1391_v11, %v1390_v15 }
 0x70a   :  { %1890 = vtanh.f32 %v1392_v16 }
 0x714   :  { %v1891_v17 = vpop.eup %1890 }
 0x715   :  { %v1394_v18 = vmul.f32 %v1891_v17, %v1889_v4 }
 0x717   :  { %1671 = vmatmul.mubr.msk.f32.vlgmr.msra.gmra.mrb[14].mxu0 %vm80_vm3, %v1394_v18  ;;  %1674 = vmatmul.mubr.msk.f32.vlgmr.msra.gmra.mrb[14].mxu1 %vm80_vm3, %v1394_v18 }
 0x7ea   :  { %v1479_v22 = vpop.f32.mrb[14].mxu0  ;;  %v1550_v23 = vpop.f32.mrb[14].mxu1 }
 0x7eb   :  { %v1555_v27 = vadd.f32 %v1479_v22, %v1406_v21  ;;  %v1481_v28 = vpop.f32.mrb[15].mxu0  ;;  %v1552_v29 = vpop.f32.mrb[15].mxu1  ;;  %v1557_v39 = vadd.f32 %v1550_v23, %v1408_v30 }
 0x7ec   :  { %v1556_v31 = vadd.f32 %v1481_v28, %v1407_v25  ;;  %v1558_v37 = vadd.f32 %v1552_v29, %v1409_v24 }
 0x7ed   :  { %v1675_v35 = vmul.f32 -1.442695, %v1555_v27 }
 0x7ee   :  { %v1676_v36 = vmul.f32 -1.442695, %v1556_v31  ;;  %v1677_v38 = vmul.f32 -1.442695, %v1558_v37 }
 0x7ef   :  { %1892 = vpow2.f32 %v1675_v35 }
 0x7f0   :  { %1894 = vpow2.f32 %v1676_v36 }
 0x7f1   :  { %1896 = vpow2.f32 %v1677_v38 }
 0x7f2   :  { %1898 = vtanh.f32 %v1557_v39 }
 0x7f9   :  { %v1893_v32 = vpop.eup %1892 }
 0x7fa   :  { %v1895_v41 = vpop.eup %1894  ;;  %v1562_v43 = vadd.f32 1.0, %v1893_v32 }
 0x7fb   :  { %v1568_v44 = vadd.f32 1.0, %v1895_v41  ;;  %v1897_v33 = vpop.eup %1896 }
 0x7fc   :  { %1900 = vrcp.f32 %v1562_v43  ;;  %v1899_v45 = vpop.eup %1898  ;;  %v1575_v48 = vadd.f32 1.0, %v1897_v33 }
 0x7fd   :  { %1902 = vrcp.f32 %v1568_v44 }
 0x7fe   :  { %1904 = vrcp.f32 %v1575_v48 }
 0x806   :  { %v1901_v46 = vpop.eup %1900 }
 0x807   :  { %v1903_v47 = vpop.eup %1902  ;;  %v1579_v40 = vmul.f32 %v1901_v46, %v1899_v45 }
 0x808   :  { %v1578_v42 = vmul.f32 %v1903_v47, %v1392_v16  ;;  %v1905_v50 = vpop.eup %1904 }
 0x80a   :  { %v1580_v49 = vadd.f32 %v1579_v40, %v1578_v42 }
 0x80c   :  { %1906 = vtanh.f32 %v1580_v49 }
 0x816   :  { %v1907_v51 = vpop.eup %1906 }
 0x817   :  { %v1582_v53 = vmul.f32 %v1907_v51, %v1905_v50 }
 0x819   :  { %v1583_v13 = vmul.f32 %v1582_v53, %v23_v52 }
 0x81b   :  { %v1585_v54 = vsel %vm1584_vm4, %v1583_v13, 0.0 }
 0x81c   :  { %1586 = vadd.xlane.f32.xlu0 %v1585_v54 }
 0x8a9   :  { %v1587_v55 = vpop.xlane.xlu0 %1586 }
 0x8aa   :  { %v1588_v2 = vadd.f32 %v1587_v55, %v23_v52 }
 0x8ac   :  { %1590 = vrot.lane.b32.xlu1 %v1588_v2, %s1911_s18 }
 0x91e   :  { %v1591_v14 = vpop.permute.xlu1 %1590 }
 0x91f   :  { %1594 = vst.msk [vmem:[%s2209_s2] sm:$0x7f] %vm1593_vm5, %v1591_v14 }

</bundles_post_ra>
